<compile_context>
chip_gen: v5e
topology: v5e:2x2
jax: 0.10.0
libtpu: 0.0.40
codegen_flags: <defaults>
</compile_context>

<pallas_src>
import functools

import jax
import jax.numpy as jnp
from jax.experimental import pallas as pl
from jax.experimental.pallas import tpu as pltpu

_LANE = 128
_SUBLANE = 8


def _round_up(x, m):
    return ((x + m - 1) // m) * m


def _nalu_resident_kernel(x_ref, wg_ref, o_ref, *, epsilon, num_layers, d):
    """All layers in one invocation: packed [W|G] weights stay resident in VMEM."""
    h = x_ref[...]                                           # (Bp, D) f32
    for l in range(num_layers):                              # tiny L: static unroll
        wg = wg_ref[l]                                       # (D, 2D): [W | G], (in, out)
        # Additive path + gate in one MXU op; multiplicative path in a second
        # (avoids computing the unused log_h @ G quadrant).
        r = jnp.dot(h, wg, preferred_element_type=jnp.float32)          # (Bp, 2D)
        a = r[:, :d]
        gate = jax.nn.sigmoid(r[:, d:])
        log_h = jnp.log(jnp.abs(h) + epsilon)
        m = jnp.exp(jnp.dot(log_h, wg[:, :d], preferred_element_type=jnp.float32))
        h = gate * a + (1.0 - gate) * m
    o_ref[...] = h.astype(o_ref.dtype)


def _nalu_streamed_kernel(x_ref, wg_ref, o_ref, h_ref, *, epsilon):
    """Large-D fallback: one grid step == one NALU cell; activation persists in
    VMEM scratch; per-layer packed [W|G] weights stream (double-buffered)."""
    layer = pl.program_id(0)
    last = pl.num_programs(0) - 1

    @pl.when(layer == 0)
    def _():
        h_ref[...] = x_ref[...]

    h = h_ref[...]                                           # (Bp, D)
    d = h.shape[1]
    wg = wg_ref[0]                                           # (D, 2D)

    r = jnp.dot(h, wg, preferred_element_type=jnp.float32)   # (Bp, 2D)
    a = r[:, :d]
    gate = jax.nn.sigmoid(r[:, d:])
    log_h = jnp.log(jnp.abs(h) + epsilon)
    m = jnp.exp(jnp.dot(log_h, wg[:, :d], preferred_element_type=jnp.float32))
    out = gate * a + (1.0 - gate) * m

    @pl.when(layer < last)
    def _():
        h_ref[...] = out                                     # carry to next cell

    @pl.when(layer == last)
    def _():
        o_ref[...] = out.astype(o_ref.dtype)


def nalu_forward(x, params, *, epsilon=1e-5):
    """Stacked NALU cells.

    x: (batch, input_size) float32
    params: list of (W_hat, M_hat, G), each (out_dim, in_dim) PyTorch-linear style.
    """
    batch, in0 = x.shape
    num_layers = len(params)
    assert num_layers >= 1
    out_last = params[-1][0].shape[0]

    # Uniform padded feature width (lane-dense) and padded batch (sublane-dense).
    dims = [in0] + [p[0].shape[0] for p in params]
    d = _round_up(max(dims), _LANE)
    bp = _round_up(max(batch, _SUBLANE), _SUBLANE)

    # Hoisted weight transform + packing (wrapper side, not in the kernel):
    #   W = tanh(W_hat) * sigmoid(M_hat), pre-transposed to (in, out),
    #   packed as [W | G] into one (L, D, 2D) f32 slab.
    # Padded ROWS are exactly zero so padded activation lanes (which hold 0.5
    # after a cell) never feed valid outputs.
    slabs = []
    for (w_hat, m_hat, g) in params:
        out_dim, in_dim = w_hat.shape
        w = jnp.tanh(w_hat.astype(jnp.float32)) * jax.nn.sigmoid(m_hat.astype(jnp.float32))
        slab = jnp.zeros((d, 2 * d), jnp.float32)
        slab = slab.at[:in_dim, :out_dim].set(w.T)
        slab = slab.at[:in_dim, d:d + out_dim].set(g.T.astype(jnp.float32))
        slabs.append(slab)
    wg_s = jnp.stack(slabs)                                  # (L, D, 2D)

    xp = jnp.zeros((bp, d), jnp.float32).at[:batch, :in0].set(x.astype(jnp.float32))

    weight_bytes = num_layers * d * 2 * d * 4
    act_bytes = bp * d * 4
    resident_budget = 40 << 20          # conservative vs v7x's 64 MiB physical VMEM

    if weight_bytes + 3 * act_bytes <= resident_budget:
        # Small case: single invocation, all weights resident, layers unrolled.
        kernel = functools.partial(
            _nalu_resident_kernel, epsilon=epsilon, num_layers=num_layers, d=d)
        out_p = pl.pallas_call(
            kernel,
            out_shape=jax.ShapeDtypeStruct((bp, d), jnp.float32),
        )(xp, wg_s)
    else:
        # Large-D fallback: stream per-layer packed weights across a layer grid.
        kernel = functools.partial(_nalu_streamed_kernel, epsilon=epsilon)
        # double-buffered (D,2D) weight slab + input/output/scratch activations.
        vmem_need = 2 * (d * 2 * d * 4) + 4 * act_bytes
        vmem_limit = min(_round_up(vmem_need + (4 << 20), 1 << 20), 100 << 20)
        out_p = pl.pallas_call(
            kernel,
            out_shape=jax.ShapeDtypeStruct((bp, d), jnp.float32),
            grid=(num_layers,),
            in_specs=[
                # Input activation: constant block index -> resident in VMEM.
                pl.BlockSpec((bp, d), lambda l: (0, 0)),
                # Per-layer packed [W|G]: streamed (double-buffered) across layers.
                pl.BlockSpec((1, d, 2 * d), lambda l: (l, 0, 0)),
            ],
            out_specs=pl.BlockSpec((bp, d), lambda l: (0, 0)),
            scratch_shapes=[pltpu.VMEM((bp, d), jnp.float32)],
            compiler_params=pltpu.CompilerParams(
                dimension_semantics=("arbitrary",),   # layers are sequential
                vmem_limit_bytes=vmem_limit,
            ),
        )(xp, wg_s)

    # TODO(synk): for large batch on v7x, add a leading "parallel" batch grid axis
    # (>=2 tiles of >=8 rows) so both TensorCores each take half the batch, and
    # store the packed weights in bf16 to halve HBM traffic at large D.
    return out_p[:batch, :out_last]


def init_nalu_params(key, input_size, hidden_size, output_size, num_layers):
    """Deterministic Xavier-uniform init of (W_hat, M_hat, G) per layer."""
    params = []
    for i in range(num_layers):
        in_dim = input_size if i == 0 else hidden_size
        out_dim = output_size if i == num_layers - 1 else hidden_size
        key, k1, k2, k3 = jax.random.split(key, 4)
        bound = (6.0 / (in_dim + out_dim)) ** 0.5
        w_hat = jax.random.uniform(k1, (out_dim, in_dim), jnp.float32, -bound, bound)
        m_hat = jax.random.uniform(k2, (out_dim, in_dim), jnp.float32, -bound, bound)
        g = jax.random.uniform(k3, (out_dim, in_dim), jnp.float32, -bound, bound)
        params.append((w_hat, m_hat, g))
    return params


def _nalu_cell_ref(x, w_hat, m_hat, g, epsilon):
    w = jnp.tanh(w_hat) * jax.nn.sigmoid(m_hat)
    a = x @ w.T
    gate = jax.nn.sigmoid(x @ g.T)
    m = jnp.exp(jnp.log(jnp.abs(x) + epsilon) @ w.T)
    return gate * a + (1.0 - gate) * m


if __name__ == "__main__":
    input_size, hidden_size, output_size, num_layers = 16, 32, 8, 3
    batch = 8
    epsilon = 1e-5

    key = jax.random.PRNGKey(0)
    key, kx = jax.random.split(key)
    x = jax.random.normal(kx, (batch, input_size), jnp.float32)

    params = init_nalu_params(key, input_size, hidden_size, output_size, num_layers)

    out = nalu_forward(x, params, epsilon=epsilon)
    out = jax.block_until_ready(out)

    # Pure-JAX reference check.
    ref = x
    for (w_hat, m_hat, g) in params:
        ref = _nalu_cell_ref(ref, w_hat, m_hat, g, epsilon)

    assert out.shape == (batch, output_size)
    assert jnp.allclose(out, ref, atol=1e-4, rtol=1e-4), "mismatch vs reference"

    print("KERNEL_OK")
</pallas_src>

<mosaic_0001>
module attributes {stable_mosaic.version = 11 : i64} {
  func.func @_nalu_resident_kernel(%arg0: memref<8x128xf32, #tpu.memory_space<vmem>>, %arg1: memref<3x128x256xf32, #tpu.memory_space<vmem>>, %arg2: memref<8x128xf32, #tpu.memory_space<vmem>>) attributes {dimension_semantics = [], scalar_prefetch = 0 : i64, scratch_operands = 0 : i64, tpu.core_type = #tpu.core_type<tc>} {
    %c0 = arith.constant 0 : index
    %c0_0 = arith.constant 0 : index
    %0 = vector.load %arg0[%c0, %c0_0] : memref<8x128xf32, #tpu.memory_space<vmem>>, vector<8x128xf32>
    %c0_1 = arith.constant 0 : index
    %c0_2 = arith.constant 0 : index
    %c0_3 = arith.constant 0 : index
    %1 = vector.load %arg1[%c0_1, %c0_2, %c0_3] : memref<3x128x256xf32, #tpu.memory_space<vmem>>, vector<1x128x256xf32>
    %2 = vector.shape_cast %1 : vector<1x128x256xf32> to vector<128x256xf32>
    %cst = arith.constant dense<0.000000e+00> : vector<8x256xf32>
    %3 = tpu.matmul %0, %2, %cst {dimension_numbers = #tpu.dot_dimension_numbers<[1], [0], [0], [1], [0, 0, 1, 1], [], []>} : vector<8x128xf32>, vector<128x256xf32>, vector<8x256xf32> -> vector<8x256xf32>
    %4 = vector.extract_strided_slice %3 {offsets = [0, 0], sizes = [8, 128], strides = [1, 1]} : vector<8x256xf32> to vector<8x128xf32>
    %5 = vector.extract_strided_slice %3 {offsets = [0, 128], sizes = [8, 128], strides = [1, 1]} : vector<8x256xf32> to vector<8x128xf32>
    %6 = arith.negf %5 : vector<8x128xf32>
    %7 = math.exp %6 : vector<8x128xf32>
    %cst_4 = arith.constant 1.000000e+00 : f32
    %8 = vector.broadcast %cst_4 : f32 to vector<8x128xf32>
    %9 = arith.addf %8, %7 : vector<8x128xf32>
    %10 = arith.divf %8, %9 : vector<8x128xf32>
    %11 = math.absf %0 : vector<8x128xf32>
    %cst_5 = arith.constant 9.99999974E-6 : f32
    %12 = vector.broadcast %cst_5 : f32 to vector<8x128xf32>
    %13 = arith.addf %11, %12 : vector<8x128xf32>
    %14 = math.log %13 : vector<8x128xf32>
    %15 = vector.extract_strided_slice %2 {offsets = [0, 0], sizes = [128, 128], strides = [1, 1]} : vector<128x256xf32> to vector<128x128xf32>
    %cst_6 = arith.constant dense<0.000000e+00> : vector<8x128xf32>
    %16 = tpu.matmul %14, %15, %cst_6 {dimension_numbers = #tpu.dot_dimension_numbers<[1], [0], [0], [1], [0, 0, 1, 1], [], []>} : vector<8x128xf32>, vector<128x128xf32>, vector<8x128xf32> -> vector<8x128xf32>
    %17 = math.exp %16 : vector<8x128xf32>
    %18 = arith.mulf %10, %4 : vector<8x128xf32>
    %cst_7 = arith.constant 1.000000e+00 : f32
    %19 = vector.broadcast %cst_7 : f32 to vector<8x128xf32>
    %20 = arith.subf %19, %10 : vector<8x128xf32>
    %21 = arith.mulf %20, %17 : vector<8x128xf32>
    %22 = arith.addf %18, %21 : vector<8x128xf32>
    %c1 = arith.constant 1 : index
    %c0_8 = arith.constant 0 : index
    %c0_9 = arith.constant 0 : index
    %23 = vector.load %arg1[%c1, %c0_8, %c0_9] : memref<3x128x256xf32, #tpu.memory_space<vmem>>, vector<1x128x256xf32>
    %24 = vector.shape_cast %23 : vector<1x128x256xf32> to vector<128x256xf32>
    %cst_10 = arith.constant dense<0.000000e+00> : vector<8x256xf32>
    %25 = tpu.matmul %22, %24, %cst_10 {dimension_numbers = #tpu.dot_dimension_numbers<[1], [0], [0], [1], [0, 0, 1, 1], [], []>} : vector<8x128xf32>, vector<128x256xf32>, vector<8x256xf32> -> vector<8x256xf32>
    %26 = vector.extract_strided_slice %25 {offsets = [0, 0], sizes = [8, 128], strides = [1, 1]} : vector<8x256xf32> to vector<8x128xf32>
    %27 = vector.extract_strided_slice %25 {offsets = [0, 128], sizes = [8, 128], strides = [1, 1]} : vector<8x256xf32> to vector<8x128xf32>
    %28 = arith.negf %27 : vector<8x128xf32>
    %29 = math.exp %28 : vector<8x128xf32>
    %cst_11 = arith.constant 1.000000e+00 : f32
    %30 = vector.broadcast %cst_11 : f32 to vector<8x128xf32>
    %31 = arith.addf %30, %29 : vector<8x128xf32>
    %32 = arith.divf %30, %31 : vector<8x128xf32>
    %33 = math.absf %22 : vector<8x128xf32>
    %cst_12 = arith.constant 9.99999974E-6 : f32
    %34 = vector.broadcast %cst_12 : f32 to vector<8x128xf32>
    %35 = arith.addf %33, %34 : vector<8x128xf32>
    %36 = math.log %35 : vector<8x128xf32>
    %37 = vector.extract_strided_slice %24 {offsets = [0, 0], sizes = [128, 128], strides = [1, 1]} : vector<128x256xf32> to vector<128x128xf32>
    %cst_13 = arith.constant dense<0.000000e+00> : vector<8x128xf32>
    %38 = tpu.matmul %36, %37, %cst_13 {dimension_numbers = #tpu.dot_dimension_numbers<[1], [0], [0], [1], [0, 0, 1, 1], [], []>} : vector<8x128xf32>, vector<128x128xf32>, vector<8x128xf32> -> vector<8x128xf32>
    %39 = math.exp %38 : vector<8x128xf32>
    %40 = arith.mulf %32, %26 : vector<8x128xf32>
    %cst_14 = arith.constant 1.000000e+00 : f32
    %41 = vector.broadcast %cst_14 : f32 to vector<8x128xf32>
    %42 = arith.subf %41, %32 : vector<8x128xf32>
    %43 = arith.mulf %42, %39 : vector<8x128xf32>
    %44 = arith.addf %40, %43 : vector<8x128xf32>
    %c2 = arith.constant 2 : index
    %c0_15 = arith.constant 0 : index
    %c0_16 = arith.constant 0 : index
    %45 = vector.load %arg1[%c2, %c0_15, %c0_16] : memref<3x128x256xf32, #tpu.memory_space<vmem>>, vector<1x128x256xf32>
    %46 = vector.shape_cast %45 : vector<1x128x256xf32> to vector<128x256xf32>
    %cst_17 = arith.constant dense<0.000000e+00> : vector<8x256xf32>
    %47 = tpu.matmul %44, %46, %cst_17 {dimension_numbers = #tpu.dot_dimension_numbers<[1], [0], [0], [1], [0, 0, 1, 1], [], []>} : vector<8x128xf32>, vector<128x256xf32>, vector<8x256xf32> -> vector<8x256xf32>
    %48 = vector.extract_strided_slice %47 {offsets = [0, 0], sizes = [8, 128], strides = [1, 1]} : vector<8x256xf32> to vector<8x128xf32>
    %49 = vector.extract_strided_slice %47 {offsets = [0, 128], sizes = [8, 128], strides = [1, 1]} : vector<8x256xf32> to vector<8x128xf32>
    %50 = arith.negf %49 : vector<8x128xf32>
    %51 = math.exp %50 : vector<8x128xf32>
    %cst_18 = arith.constant 1.000000e+00 : f32
    %52 = vector.broadcast %cst_18 : f32 to vector<8x128xf32>
    %53 = arith.addf %52, %51 : vector<8x128xf32>
    %54 = arith.divf %52, %53 : vector<8x128xf32>
    %55 = math.absf %44 : vector<8x128xf32>
    %cst_19 = arith.constant 9.99999974E-6 : f32
    %56 = vector.broadcast %cst_19 : f32 to vector<8x128xf32>
    %57 = arith.addf %55, %56 : vector<8x128xf32>
    %58 = math.log %57 : vector<8x128xf32>
    %59 = vector.extract_strided_slice %46 {offsets = [0, 0], sizes = [128, 128], strides = [1, 1]} : vector<128x256xf32> to vector<128x128xf32>
    %cst_20 = arith.constant dense<0.000000e+00> : vector<8x128xf32>
    %60 = tpu.matmul %58, %59, %cst_20 {dimension_numbers = #tpu.dot_dimension_numbers<[1], [0], [0], [1], [0, 0, 1, 1], [], []>} : vector<8x128xf32>, vector<128x128xf32>, vector<8x128xf32> -> vector<8x128xf32>
    %61 = math.exp %60 : vector<8x128xf32>
    %62 = arith.mulf %54, %48 : vector<8x128xf32>
    %cst_21 = arith.constant 1.000000e+00 : f32
    %63 = vector.broadcast %cst_21 : f32 to vector<8x128xf32>
    %64 = arith.subf %63, %54 : vector<8x128xf32>
    %65 = arith.mulf %64, %61 : vector<8x128xf32>
    %66 = arith.addf %62, %65 : vector<8x128xf32>
    %c0_22 = arith.constant 0 : index
    %c0_23 = arith.constant 0 : index
    %67 = vector.load %arg2[%c0_22, %c0_23] : memref<8x128xf32, #tpu.memory_space<vmem>>, vector<8x128xf32>
    tpu.vector_store %arg2[%c0_22, %c0_23], %66 {strides = array<i32>} : memref<8x128xf32, #tpu.memory_space<vmem>>, vector<8x128xf32>,
    return
  }
}

</mosaic_0001>

<bundles_post_ra>
// kernel: tpu_custom_call.1
= control target key start
LH: loop header
LB: loop body
LE: loop exit
PB: predicated region body
PF: predicated region fallthrough
CT: control target
= control target key end

     0   :  { %7 = vsyncpa [#allocation3], 0  ;;  %s566_s0 = inlined_call_operand.hbm [shape: f32[8,128], index: 0, kind: input, shape index: {}]   ;;  %s567_s1 = inlined_call_operand.hbm [shape: f32[3,128,256], index: 1, kind: input, shape index: {}]   ;;  %s568_s2 = inlined_call_operand.hbm [shape: f32[8,128], index: 2, kind: output, shape index: {}]  }
   0x1   :  { %8 = vsyncpa [#allocation6], 0 }
   0x2   :  { %9 = vsyncpa [#allocation4], 0  ;;  %s15_s11 = sshll.u32 %s566_s0, 4  ;;  %s537_s12 = smov [#allocation2]   ;;  %s16_s11 = int_to_ptr.hbm [resolvable:$true] %s15_s11 }
   0x3   :  { %s17_s13 = sshll.u32 %s537_s12, 4  ;;  %s25_s16 = sshll.u32 %s567_s1, 4  ;;  %s18_s13 = int_to_ptr.vmem [resolvable:$true] %s17_s13  ;;  %s26_s16 = int_to_ptr.hbm [resolvable:$true] %s25_s16 }
   0x4   :  { %20 = dma.hbm_to_vmem [thread:$0]  %s16_s11, 128, %s18_s13, [#allocation3]  }
   0x5   :  { %s538_s17 = smov [#allocation5]   ;;  %s539_s19 = smov 256  }
   0x6   :  { %s27_s18 = sshll.u32 %s538_s17, 4  ;;  %s540_s20 = smov 16   ;;  %s28_s18 = int_to_ptr.vmem [resolvable:$true] %s27_s18 }
   0x7   :  { %33 = dma.hbm_to_vmem [thread:$0]  %s26_s16, 12288, %s28_s18, [#allocation6], %s539_s19, %s539_s19, %s540_s20  }
   0x8   :  { %531 = dma.done.wait [#allocation3], 128  }
   0x9   :  { %532 = vsyncadd [#allocation3], 4294967168 }
   0xa   :  { %533 = dma.done.wait [#allocation6], 12288  }
   0xb   :  { %534 = vsyncadd [#allocation6], 4294955008  ;;  %v74_v0 = vld [vmem:[#allocation5 + $0xf8] sm:$0xff]  ;;  %v72_v1 = vld [vmem:[#allocation5 + $0xe8] sm:$0xff]  ;;  %s541_s0 = smov [#allocation7]   ;;  %s416_s23 = sshll.u32 %s568_s2, 4  ;;  %s417_s23 = int_to_ptr.hbm [resolvable:$true] %s416_s23 }
   0xc   :  { %95 = vmatpush.msra.mxu1 %v74_v0  ;;  %v70_v2 = vld [vmem:[#allocation5 + $0xd8] sm:$0xff]  ;;  %v73_v3 = vld [vmem:[#allocation5 + $0xf0] sm:$0xff]  ;;  %v71_v4 = vld [vmem:[#allocation5 + $0xe0] sm:$0xff]  ;;  %s414_s1 = sshll.u32 %s541_s0, 4  ;;  %s415_s1 = int_to_ptr.vmem [resolvable:$true] %s414_s1 }
   0xd   :  { %138 = vmatpush.msra.mxu2 %v73_v3  ;;  %v68_v5 = vld [vmem:[#allocation5 + $0xc8] sm:$0xff]  ;;  %v69_v6 = vld [vmem:[#allocation5 + $0xd0] sm:$0xff]  ;;  %75 = vmatpush.msra.mxu0 %v73_v3  ;;  %v66_v7 = vld [vmem:[#allocation5 + $0xb8] sm:$0xff] }
   0xe   :  { %96 = vmatpush.msra.mxu1 %v72_v1  ;;  %v67_v8 = vld [vmem:[#allocation5 + $0xc0] sm:$0xff]  ;;  %v64_v9 = vld [vmem:[#allocation5 + $0xa8] sm:$0xff]  ;;  %v65_v10 = vld [vmem:[#allocation5 + $0xb0] sm:$0xff] }
   0xf   :  { %139 = vmatpush.msra.mxu2 %v71_v4  ;;  %76 = vmatpush.msra.mxu0 %v71_v4  ;;  %v62_v11 = vld [vmem:[#allocation5 + $0x98] sm:$0xff]  ;;  %v63_v12 = vld [vmem:[#allocation5 + $0xa0] sm:$0xff]  ;;  %v60_v13 = vld [vmem:[#allocation5 + $0x88] sm:$0xff] }
  0x10   :  { %97 = vmatpush.msra.mxu1 %v70_v2  ;;  %v61_v14 = vld [vmem:[#allocation5 + $0x90] sm:$0xff]  ;;  %v42_v15 = vld [vmem:[#allocation2] sm:$0xff]  ;;  %v59_v18 = vld [vmem:[#allocation5 + $0x80] sm:$0xff] }
  0x11   :  { %140 = vmatpush.msra.mxu2 %v69_v6  ;;  %77 = vmatpush.msra.mxu0 %v69_v6  ;;  %v134_v16 = vand.u32 2147483647, %v42_v15  ;;  %v58_v17 = vld [vmem:[#allocation5 + $0x78] sm:$0xff]  ;;  %v56_v19 = vld [vmem:[#allocation5 + $0x68] sm:$0xff]  ;;  %v57_v20 = vld [vmem:[#allocation5 + $0x70] sm:$0xff] }
  0x12   :  { %98 = vmatpush.msra.mxu1 %v68_v5  ;;  %v54_v22 = vld [vmem:[#allocation5 + $0x58] sm:$0xff]  ;;  %v55_v23 = vld [vmem:[#allocation5 + $0x60] sm:$0xff]  ;;  %v52_v24 = vld [vmem:[#allocation5 + $0x48] sm:$0xff] }
  0x13   :  { %141 = vmatpush.msra.mxu2 %v67_v8  ;;  %78 = vmatpush.msra.mxu0 %v67_v8  ;;  %v135_v21 = vadd.f32 1e-05, %v134_v16  ;;  %v53_v25 = vld [vmem:[#allocation5 + $0x50] sm:$0xff]  ;;  %v50_v26 = vld [vmem:[#allocation5 + $0x38] sm:$0xff]  ;;  %v51_v27 = vld [vmem:[#allocation5 + $0x40] sm:$0xff] }
  0x14   :  { %99 = vmatpush.msra.mxu1 %v66_v7  ;;  %v48_v28 = vld [vmem:[#allocation5 + $0x28] sm:$0xff]  ;;  %v49_v29 = vld [vmem:[#allocation5 + $0x30] sm:$0xff]  ;;  %v46_v30 = vld [vmem:[#allocation5 + $0x18] sm:$0xff] }
  0x15   :  { %142 = vmatpush.msra.mxu2 %v65_v10  ;;  %79 = vmatpush.msra.mxu0 %v65_v10  ;;  %435 = vlog2.f32 %v135_v21  ;;  %v47_v31 = vld [vmem:[#allocation5 + $0x20] sm:$0xff]  ;;  %v44_v33 = vld [vmem:[#allocation5 + $0x8] sm:$0xff]  ;;  %v45_v34 = vld [vmem:[#allocation5 + $0x10] sm:$0xff] }
  0x16   :  { %100 = vmatpush.msra.mxu1 %v64_v9  ;;  %v43_v35 = vld [vmem:[#allocation5] sm:$0xff]  ;;  %v195_v37 = vld [vmem:[#allocation5 + $0x1f0] sm:$0xff]  ;;  %v196_v38 = vld [vmem:[#allocation5 + $0x1f8] sm:$0xff] }
  0x17   :  { %143 = vmatpush.msra.mxu2 %v63_v12  ;;  %80 = vmatpush.msra.mxu0 %v63_v12  ;;  %v193_v39 = vld [vmem:[#allocation5 + $0x1e0] sm:$0xff]  ;;  %v194_v40 = vld [vmem:[#allocation5 + $0x1e8] sm:$0xff]  ;;  %v191_v41 = vld [vmem:[#allocation5 + $0x1d0] sm:$0xff] }
  0x18   :  { %101 = vmatpush.msra.mxu1 %v62_v11  ;;  %197 = vmatpush.msra.mxu3 %v195_v37  ;;  %v192_v42 = vld [vmem:[#allocation5 + $0x1d8] sm:$0xff]  ;;  %v189_v43 = vld [vmem:[#allocation5 + $0x1c0] sm:$0xff]  ;;  %v190_v44 = vld [vmem:[#allocation5 + $0x1c8] sm:$0xff] }
  0x19   :  { %144 = vmatpush.msra.mxu2 %v61_v14  ;;  %81 = vmatpush.msra.mxu0 %v61_v14  ;;  %v187_v45 = vld [vmem:[#allocation5 + $0x1b0] sm:$0xff]  ;;  %v188_v46 = vld [vmem:[#allocation5 + $0x1b8] sm:$0xff]  ;;  %v185_v47 = vld [vmem:[#allocation5 + $0x1a0] sm:$0xff] }
  0x1a   :  { %102 = vmatpush.msra.mxu1 %v60_v13  ;;  %198 = vmatpush.msra.mxu3 %v193_v39  ;;  %v186_v48 = vld [vmem:[#allocation5 + $0x1a8] sm:$0xff]  ;;  %v183_v49 = vld [vmem:[#allocation5 + $0x190] sm:$0xff]  ;;  %v184_v50 = vld [vmem:[#allocation5 + $0x198] sm:$0xff] }
  0x1b   :  { %145 = vmatpush.msra.mxu2 %v59_v18  ;;  %82 = vmatpush.msra.mxu0 %v59_v18  ;;  %v436_v32 = vpop.eup %435  ;;  %v181_v51 = vld [vmem:[#allocation5 + $0x180] sm:$0xff]  ;;  %v182_v52 = vld [vmem:[#allocation5 + $0x188] sm:$0xff]  ;;  %v179_v53 = vld [vmem:[#allocation5 + $0x170] sm:$0xff] }
  0x1c   :  { %103 = vmatpush.msra.mxu1 %v58_v17  ;;  %v137_v36 = vmul.f32 0.6931472, %v436_v32  ;;  %199 = vmatpush.msra.mxu3 %v191_v41  ;;  %v180_v54 = vld [vmem:[#allocation5 + $0x178] sm:$0xff]  ;;  %v177_v55 = vld [vmem:[#allocation5 + $0x160] sm:$0xff]  ;;  %v178_v56 = vld [vmem:[#allocation5 + $0x168] sm:$0xff] }
  0x1d   :  { %146 = vmatpush.msra.mxu2 %v57_v20  ;;  %83 = vmatpush.msra.mxu0 %v57_v20  ;;  %v175_v57 = vld [vmem:[#allocation5 + $0x150] sm:$0xff]  ;;  %v176_v58 = vld [vmem:[#allocation5 + $0x158] sm:$0xff]  ;;  %v173_v59 = vld [vmem:[#allocation5 + $0x140] sm:$0xff] }
  0x1e   :  { %104 = vmatpush.msra.mxu1 %v56_v19  ;;  %200 = vmatpush.msra.mxu3 %v189_v43  ;;  %v174_v60 = vld [vmem:[#allocation5 + $0x148] sm:$0xff]  ;;  %v171_v61 = vld [vmem:[#allocation5 + $0x130] sm:$0xff]  ;;  %v172_v62 = vld [vmem:[#allocation5 + $0x138] sm:$0xff] }
  0x1f   :  { %147 = vmatpush.msra.mxu2 %v55_v23  ;;  %84 = vmatpush.msra.mxu0 %v55_v23  ;;  %v169_v63 = vld [vmem:[#allocation5 + $0x120] sm:$0xff]  ;;  %v170_v0 = vld [vmem:[#allocation5 + $0x128] sm:$0xff]  ;;  %v167_v1 = vld [vmem:[#allocation5 + $0x110] sm:$0xff] }
  0x20   :  { %105 = vmatpush.msra.mxu1 %v54_v22  ;;  %201 = vmatpush.msra.mxu3 %v187_v45  ;;  %v168_v2 = vld [vmem:[#allocation5 + $0x118] sm:$0xff]  ;;  %v165_v5 = vld [vmem:[#allocation5 + $0x100] sm:$0xff]  ;;  %v166_v6 = vld [vmem:[#allocation5 + $0x108] sm:$0xff] }
  0x21   :  { %148 = vmatpush.msra.mxu2 %v53_v25  ;;  %85 = vmatpush.msra.mxu0 %v53_v25  ;;  %v318_v32 = vld [vmem:[#allocation5 + $0x2f8] sm:$0xff] }
  0x22   :  { %106 = vmatpush.msra.mxu1 %v52_v24  ;;  %202 = vmatpush.msra.mxu3 %v185_v47 }
  0x23   :  { %149 = vmatpush.msra.mxu2 %v51_v27  ;;  %86 = vmatpush.msra.mxu0 %v51_v27 }
  0x24   :  { %107 = vmatpush.msra.mxu1 %v50_v26  ;;  %203 = vmatpush.msra.mxu3 %v183_v49 }
  0x25   :  { %150 = vmatpush.msra.mxu2 %v49_v29  ;;  %87 = vmatpush.msra.mxu0 %v49_v29 }
  0x26   :  { %108 = vmatpush.msra.mxu1 %v48_v28  ;;  %204 = vmatpush.msra.mxu3 %v181_v51 }
  0x27   :  { %151 = vmatpush.msra.mxu2 %v47_v31  ;;  %88 = vmatpush.msra.mxu0 %v47_v31  ;;  %v317_v31 = vld [vmem:[#allocation5 + $0x2f0] sm:$0xff] }
  0x28   :  { %109 = vmatpush.msra.mxu1 %v46_v30  ;;  %205 = vmatpush.msra.mxu3 %v179_v53 }
  0x29   :  { %152 = vmatpush.msra.mxu2 %v45_v34  ;;  %89 = vmatpush.msra.mxu0 %v45_v34  ;;  %v316_v34 = vld [vmem:[#allocation5 + $0x2e8] sm:$0xff] }
  0x2a   :  { %110 = vmatpush.msra.mxu1 %v44_v33  ;;  %206 = vmatpush.msra.mxu3 %v177_v55  ;;  %v315_v33 = vld [vmem:[#allocation5 + $0x2e0] sm:$0xff] }
  0x2b   :  { %111 = vmatmul.f32.vlgmr.msra.gmra.mxu1 %v42_v15  ;;  %153 = vmatpush.msra.mxu2 %v43_v35 }
  0x2c   :  { %154 = vmatmul.f32.vlgmr.msra.gmra.mxu2 %v137_v36  ;;  %90 = vmatpush.msra.mxu0 %v43_v35  ;;  %v313_v35 = vld [vmem:[#allocation5 + $0x2d0] sm:$0xff]  ;;  %v314_v36 = vld [vmem:[#allocation5 + $0x2d8] sm:$0xff] }
  0x2d   :  { %91 = vmatmul.f32.vlgmr.msra.gmra.mxu0 %v42_v15  ;;  %260 = vmatpush.msrb.mxu1 %v195_v37  ;;  %v311_v37 = vld [vmem:[#allocation5 + $0x2c0] sm:$0xff] }
  0x2e   :  { %217 = vmatpush.msrb.mxu0 %v196_v38  ;;  %207 = vmatpush.msra.mxu3 %v175_v57  ;;  %v312_v38 = vld [vmem:[#allocation5 + $0x2c8] sm:$0xff] }
  0x2f   :  { %261 = vmatpush.msrb.mxu1 %v193_v39  ;;  %319 = vmatpush.msrb.mxu2 %v317_v31  ;;  %v309_v39 = vld [vmem:[#allocation5 + $0x2b0] sm:$0xff] }
  0x30   :  { %218 = vmatpush.msrb.mxu0 %v194_v40  ;;  %208 = vmatpush.msra.mxu3 %v173_v59  ;;  %v310_v40 = vld [vmem:[#allocation5 + $0x2b8] sm:$0xff] }
  0x31   :  { %262 = vmatpush.msrb.mxu1 %v191_v41  ;;  %320 = vmatpush.msrb.mxu2 %v315_v33  ;;  %v307_v41 = vld [vmem:[#allocation5 + $0x2a0] sm:$0xff] }
  0x32   :  { %219 = vmatpush.msrb.mxu0 %v192_v42  ;;  %209 = vmatpush.msra.mxu3 %v171_v61  ;;  %v308_v42 = vld [vmem:[#allocation5 + $0x2a8] sm:$0xff] }
  0x33   :  { %263 = vmatpush.msrb.mxu1 %v189_v43  ;;  %321 = vmatpush.msrb.mxu2 %v313_v35  ;;  %v305_v43 = vld [vmem:[#allocation5 + $0x290] sm:$0xff] }
  0x34   :  { %220 = vmatpush.msrb.mxu0 %v190_v44  ;;  %210 = vmatpush.msra.mxu3 %v169_v63  ;;  %v306_v44 = vld [vmem:[#allocation5 + $0x298] sm:$0xff] }
  0x35   :  { %264 = vmatpush.msrb.mxu1 %v187_v45  ;;  %322 = vmatpush.msrb.mxu2 %v311_v37  ;;  %v303_v45 = vld [vmem:[#allocation5 + $0x280] sm:$0xff] }
  0x36   :  { %221 = vmatpush.msrb.mxu0 %v188_v46  ;;  %211 = vmatpush.msra.mxu3 %v167_v1  ;;  %v304_v46 = vld [vmem:[#allocation5 + $0x288] sm:$0xff] }
  0x37   :  { %265 = vmatpush.msrb.mxu1 %v185_v47  ;;  %323 = vmatpush.msrb.mxu2 %v309_v39  ;;  %v301_v47 = vld [vmem:[#allocation5 + $0x270] sm:$0xff] }
  0x38   :  { %222 = vmatpush.msrb.mxu0 %v186_v48  ;;  %212 = vmatpush.msra.mxu3 %v165_v5  ;;  %v302_v48 = vld [vmem:[#allocation5 + $0x278] sm:$0xff] }
  0x39   :  { %266 = vmatpush.msrb.mxu1 %v183_v49  ;;  %324 = vmatpush.msrb.mxu2 %v307_v41  ;;  %v299_v49 = vld [vmem:[#allocation5 + $0x260] sm:$0xff] }
  0x3a   :  { %223 = vmatpush.msrb.mxu0 %v184_v50  ;;  %339 = vmatpush.msrb.mxu3 %v318_v32  ;;  %v300_v50 = vld [vmem:[#allocation5 + $0x268] sm:$0xff] }
  0x3b   :  { %267 = vmatpush.msrb.mxu1 %v181_v51  ;;  %325 = vmatpush.msrb.mxu2 %v305_v43  ;;  %v297_v51 = vld [vmem:[#allocation5 + $0x250] sm:$0xff] }
  0x3c   :  { %224 = vmatpush.msrb.mxu0 %v182_v52  ;;  %340 = vmatpush.msrb.mxu3 %v316_v34  ;;  %v298_v52 = vld [vmem:[#allocation5 + $0x258] sm:$0xff] }
  0x3d   :  { %268 = vmatpush.msrb.mxu1 %v179_v53  ;;  %326 = vmatpush.msrb.mxu2 %v303_v45  ;;  %v295_v53 = vld [vmem:[#allocation5 + $0x240] sm:$0xff] }
  0x3e   :  { %225 = vmatpush.msrb.mxu0 %v180_v54  ;;  %341 = vmatpush.msrb.mxu3 %v314_v36  ;;  %v296_v54 = vld [vmem:[#allocation5 + $0x248] sm:$0xff] }
  0x3f   :  { %269 = vmatpush.msrb.mxu1 %v177_v55  ;;  %327 = vmatpush.msrb.mxu2 %v301_v47  ;;  %v293_v55 = vld [vmem:[#allocation5 + $0x230] sm:$0xff] }
  0x40   :  { %226 = vmatpush.msrb.mxu0 %v178_v56  ;;  %342 = vmatpush.msrb.mxu3 %v312_v38  ;;  %v294_v56 = vld [vmem:[#allocation5 + $0x238] sm:$0xff] }
  0x41   :  { %270 = vmatpush.msrb.mxu1 %v175_v57  ;;  %328 = vmatpush.msrb.mxu2 %v299_v49  ;;  %v291_v57 = vld [vmem:[#allocation5 + $0x220] sm:$0xff] }
  0x42   :  { %227 = vmatpush.msrb.mxu0 %v176_v58  ;;  %343 = vmatpush.msrb.mxu3 %v310_v40  ;;  %v292_v58 = vld [vmem:[#allocation5 + $0x228] sm:$0xff] }
  0x43   :  { %271 = vmatpush.msrb.mxu1 %v173_v59  ;;  %329 = vmatpush.msrb.mxu2 %v297_v51  ;;  %v289_v59 = vld [vmem:[#allocation5 + $0x210] sm:$0xff] }
  0x44   :  { %228 = vmatpush.msrb.mxu0 %v174_v60  ;;  %344 = vmatpush.msrb.mxu3 %v308_v42  ;;  %v290_v60 = vld [vmem:[#allocation5 + $0x218] sm:$0xff] }
  0x45   :  { %272 = vmatpush.msrb.mxu1 %v171_v61  ;;  %330 = vmatpush.msrb.mxu2 %v295_v53  ;;  %v287_v61 = vld [vmem:[#allocation5 + $0x200] sm:$0xff] }
  0x46   :  { %229 = vmatpush.msrb.mxu0 %v172_v62  ;;  %345 = vmatpush.msrb.mxu3 %v306_v44  ;;  %v288_v62 = vld [vmem:[#allocation5 + $0x208] sm:$0xff] }
  0x47   :  { %273 = vmatpush.msrb.mxu1 %v169_v63  ;;  %331 = vmatpush.msrb.mxu2 %v293_v55 }
  0x48   :  { %230 = vmatpush.msrb.mxu0 %v170_v0  ;;  %346 = vmatpush.msrb.mxu3 %v304_v46 }
  0x49   :  { %274 = vmatpush.msrb.mxu1 %v167_v1  ;;  %332 = vmatpush.msrb.mxu2 %v291_v57 }
  0x4a   :  { %231 = vmatpush.msrb.mxu0 %v168_v2  ;;  %347 = vmatpush.msrb.mxu3 %v302_v48 }
  0x4b   :  { %275 = vmatpush.msrb.mxu1 %v165_v5  ;;  %333 = vmatpush.msrb.mxu2 %v289_v59 }
  0x4c   :  { %232 = vmatpush.msrb.mxu0 %v166_v6  ;;  %348 = vmatpush.msrb.mxu3 %v300_v50 }
  0x4d   :  { %334 = vmatpush.msrb.mxu2 %v287_v61 }
  0x4e   :  { %382 = vmatpush.msra.mxu0 %v317_v31  ;;  %349 = vmatpush.msrb.mxu3 %v298_v52 }
  0x50   :  { %383 = vmatpush.msra.mxu0 %v315_v33  ;;  %350 = vmatpush.msrb.mxu3 %v296_v54 }
  0x52   :  { %384 = vmatpush.msra.mxu0 %v313_v35  ;;  %351 = vmatpush.msrb.mxu3 %v294_v56 }
  0x54   :  { %385 = vmatpush.msra.mxu0 %v311_v37  ;;  %352 = vmatpush.msrb.mxu3 %v292_v58 }
  0x56   :  { %386 = vmatpush.msra.mxu0 %v309_v39  ;;  %353 = vmatpush.msrb.mxu3 %v290_v60 }
  0x58   :  { %387 = vmatpush.msra.mxu0 %v307_v41  ;;  %354 = vmatpush.msrb.mxu3 %v288_v62 }
  0x5a   :  { %388 = vmatpush.msra.mxu0 %v305_v43 }
  0x5c   :  { %389 = vmatpush.msra.mxu0 %v303_v45 }
  0x5e   :  { %390 = vmatpush.msra.mxu0 %v301_v47 }
  0x60   :  { %391 = vmatpush.msra.mxu0 %v299_v49 }
  0x62   :  { %392 = vmatpush.msra.mxu0 %v297_v51 }
  0x64   :  { %393 = vmatpush.msra.mxu0 %v295_v53 }
  0x66   :  { %394 = vmatpush.msra.mxu0 %v293_v55 }
  0x68   :  { %395 = vmatpush.msra.mxu0 %v291_v57 }
  0x6a   :  { %396 = vmatpush.msra.mxu0 %v289_v59 }
  0x6c   :  { %397 = vmatpush.msra.mxu0 %v287_v61 }
  0xa8   :  { %v112_v3 = vpop.f32.mrf.mxu1 }
  0xa9   :  { %v427_v4 = vmul.f32 -1.442695, %v112_v3 }
  0xaa   :  { %v92_v21 = vpop.f32.mrf.mxu0 }
  0xab   :  { %437 = vpow2.f32 %v427_v4 }
  0xaf   :  { %v155_v9 = vpop.f32.mrf.mxu2 }
  0xb0   :  { %v158_v11 = vmul.f32 1.442695, %v155_v9 }
  0xb1   :  { %v438_v7 = vpop.eup %437 }
  0xb2   :  { %v118_v8 = vadd.f32 1.0, %v438_v7 }
  0xb4   :  { %439 = vrcp.f32 %v118_v8  ;;  %v130_v14 = vand.u32 2147483648, %v118_v8  ;;  %v128_v16 = vand.u32 2147483647, %v118_v8  ;;  %vm124_vm1 = vweird.f32 %v118_v8 }
  0xb5   :  { %441 = vpow2.f32 %v158_v11 }
  0xb6   :  { %v131_v18 = vor.u32 1.1754944e-38, %v130_v14  ;;  %vm129_vm3 = vcmp.eq.f32.partialorder %v128_v16, 8.507059e+37 }
  0xba   :  { %v440_v10 = vpop.eup %439 }
  0xbb   :  { %v120_v12 = vmul.f32 %v440_v10, %v118_v8  ;;  %vm125_vm0 = vweird.f32 %v440_v10  ;;  %v442_v20 = vpop.eup %441 }
  0xbc   :  { %vm126_vm2 = vmor %vm124_vm1, %vm125_vm0 }
  0xbd   :  { %v121_v13 = vsub.f32 1.0, %v120_v12 }
  0xbf   :  { %v122_v15 = vmul.f32 %v440_v10, %v121_v13 }
  0xc1   :  { %v123_v17 = vadd.f32 %v440_v10, %v122_v15 }
  0xc3   :  { %v127_v19 = vsel %vm126_vm2, %v440_v10, %v123_v17 }
  0xc4   :  { %v132_v22 = vsel %vm129_vm3, %v131_v18, %v127_v19 }
  0xc5   :  { %v161_v23 = vsub.f32 1.0, %v132_v22  ;;  %v160_v24 = vmul.f32 %v132_v22, %v92_v21 }
  0xc7   :  { %v162_v25 = vmul.f32 %v442_v20, %v161_v23 }
  0xc9   :  { %v163_v26 = vadd.f32 %v162_v25, %v160_v24 }
  0xcb   :  { %213 = vmatmul.f32.vlgmr.msra.gmra.mxu3 %v163_v26  ;;  %233 = vmatmul.f32.vlgmr.msrb.gmra.mxu0 %v163_v26  ;;  %v256_v27 = vand.u32 2147483647, %v163_v26 }
  0xcd   :  { %v257_v28 = vadd.f32 1e-05, %v256_v27 }
  0xcf   :  { %443 = vlog2.f32 %v257_v28 }
  0xd5   :  { %v444_v29 = vpop.eup %443 }
  0xd6   :  { %v259_v30 = vmul.f32 0.6931472, %v444_v29 }
  0xd8   :  { %276 = vmatmul.f32.vlgmr.msrb.gmra.mxu1 %v259_v30 }
 0x148   :  { %v234_v63 = vpop.f32.mrf.mxu0 }
 0x149   :  { %v428_v0 = vmul.f32 -1.442695, %v234_v63 }
 0x14b   :  { %445 = vpow2.f32 %v428_v0 }
 0x14e   :  { %v214_v17 = vpop.f32.mrf.mxu3 }
 0x151   :  { %v446_v1 = vpop.eup %445 }
 0x152   :  { %v240_v2 = vadd.f32 1.0, %v446_v1 }
 0x154   :  { %447 = vrcp.f32 %v240_v2  ;;  %v252_v8 = vand.u32 2147483648, %v240_v2  ;;  %v250_v10 = vand.u32 2147483647, %v240_v2  ;;  %vm246_vm5 = vweird.f32 %v240_v2 }
 0x155   :  { %v277_v3 = vpop.f32.mrf.mxu1 }
 0x156   :  { %v280_v6 = vmul.f32 1.442695, %v277_v3  ;;  %v253_v12 = vor.u32 1.1754944e-38, %v252_v8  ;;  %vm251_vm7 = vcmp.eq.f32.partialorder %v250_v10, 8.507059e+37 }
 0x158   :  { %449 = vpow2.f32 %v280_v6 }
 0x15a   :  { %v448_v4 = vpop.eup %447 }
 0x15b   :  { %v242_v5 = vmul.f32 %v448_v4, %v240_v2  ;;  %vm247_vm4 = vweird.f32 %v448_v4 }
 0x15c   :  { %vm248_vm6 = vmor %vm246_vm5, %vm247_vm4 }
 0x15d   :  { %v243_v7 = vsub.f32 1.0, %v242_v5 }
 0x15e   :  { %v450_v16 = vpop.eup %449 }
 0x15f   :  { %v244_v9 = vmul.f32 %v448_v4, %v243_v7 }
 0x161   :  { %v245_v11 = vadd.f32 %v448_v4, %v244_v9 }
 0x163   :  { %v249_v13 = vsel %vm248_vm6, %v448_v4, %v245_v11 }
 0x164   :  { %v254_v14 = vsel %vm251_vm7, %v253_v12, %v249_v13 }
 0x165   :  { %v283_v15 = vsub.f32 1.0, %v254_v14  ;;  %v282_v18 = vmul.f32 %v254_v14, %v214_v17 }
 0x167   :  { %v284_v19 = vmul.f32 %v450_v16, %v283_v15 }
 0x169   :  { %v285_v20 = vadd.f32 %v284_v19, %v282_v18 }
 0x16b   :  { %335 = vmatmul.f32.vlgmr.msrb.gmra.mxu2 %v285_v20  ;;  %v378_v21 = vand.u32 2147483647, %v285_v20  ;;  %355 = vmatmul.f32.vlgmr.msrb.gmra.mxu3 %v285_v20 }
 0x16d   :  { %v379_v22 = vadd.f32 1e-05, %v378_v21 }
 0x16f   :  { %451 = vlog2.f32 %v379_v22 }
 0x175   :  { %v452_v23 = vpop.eup %451 }
 0x176   :  { %v381_v24 = vmul.f32 0.6931472, %v452_v23 }
 0x178   :  { %398 = vmatmul.f32.vlgmr.msra.gmra.mxu0 %v381_v24 }
 0x1ee   :  { %v356_v25 = vpop.f32.mrf.mxu3  ;;  %v336_v43 = vpop.f32.mrf.mxu2 }
 0x1ef   :  { %v429_v26 = vmul.f32 -1.442695, %v356_v25 }
 0x1f1   :  { %453 = vpow2.f32 %v429_v26 }
 0x1f5   :  { %v399_v29 = vpop.f32.mrf.mxu0 }
 0x1f6   :  { %v402_v32 = vmul.f32 1.442695, %v399_v29 }
 0x1f7   :  { %v454_v27 = vpop.eup %453 }
 0x1f8   :  { %v362_v28 = vadd.f32 1.0, %v454_v27 }
 0x1fa   :  { %455 = vrcp.f32 %v362_v28  ;;  %v374_v34 = vand.u32 2147483648, %v362_v28  ;;  %v372_v36 = vand.u32 2147483647, %v362_v28  ;;  %vm368_vm9 = vweird.f32 %v362_v28 }
 0x1fb   :  { %457 = vpow2.f32 %v402_v32 }
 0x1fc   :  { %v375_v38 = vor.u32 1.1754944e-38, %v374_v34  ;;  %vm373_vm11 = vcmp.eq.f32.partialorder %v372_v36, 8.507059e+37 }
 0x200   :  { %v456_v30 = vpop.eup %455 }
 0x201   :  { %v364_v31 = vmul.f32 %v456_v30, %v362_v28  ;;  %vm369_vm8 = vweird.f32 %v456_v30  ;;  %v458_v42 = vpop.eup %457 }
 0x202   :  { %vm370_vm10 = vmor %vm368_vm9, %vm369_vm8 }
 0x203   :  { %v365_v33 = vsub.f32 1.0, %v364_v31 }
 0x205   :  { %v366_v35 = vmul.f32 %v456_v30, %v365_v33 }
 0x207   :  { %v367_v37 = vadd.f32 %v456_v30, %v366_v35 }
 0x209   :  { %v371_v39 = vsel %vm370_vm10, %v456_v30, %v367_v37 }
 0x20a   :  { %v376_v40 = vsel %vm373_vm11, %v375_v38, %v371_v39 }
 0x20b   :  { %v405_v41 = vsub.f32 1.0, %v376_v40  ;;  %v404_v45 = vmul.f32 %v376_v40, %v336_v43 }
 0x20d   :  { %v406_v44 = vmul.f32 %v458_v42, %v405_v41 }
 0x20f   :  { %v407_v46 = vadd.f32 %v406_v44, %v404_v45 }
 0x211   :  { %408 = vst [vmem:[#allocation7] sm:$0xff] %v407_v46 }
 0x212   :  { %419 = dma.vmem_to_hbm [thread:$0]  %s415_s1, 128, %s417_s23, [#allocation4]  }
 0x213   :  { %535 = dma.done.wait [#allocation4], 128  }
 0x214   :  { %536 = vsyncadd [#allocation4], 4294967168 }
 0x215   :  { %424 = vsyncpa [#allocation3], 1 }
 0x216   :  { %425 = vsyncpa [#allocation6], 1 }
 0x217   :  { %426 = vsyncpa [#allocation4], 1 }

</bundles_post_ra>
